<compile_context>
chip_gen: v7x
topology: tpu7x:2x2x1
jax: 0.10.0
libtpu: 0.0.40
codegen_flags: <defaults>
</compile_context>

<pallas_src>
import functools

import jax
import jax.numpy as jnp
from jax.experimental import pallas as pl
from jax.experimental.pallas import tpu as pltpu

_LANE = 128
_SUBLANE = 8


def _round_up(n, m):
    return ((n + m - 1) // m) * m


# ----------------------------------------------------------------------------
# Kernel
# ----------------------------------------------------------------------------
def _dlcais_kernel(x_ref, lstm_w_ref, states_ref, head_w_ref, head_b_ref,
                   out_ref, *, hidden, feat):
    """F = feat lanes for all fused inputs / head; gates are round_up(4H,128)."""
    H, F = hidden, feat
    Bp = x_ref.shape[0]

    # h_full always has F lanes with zeros beyond the valid data, so the
    # pre-shifted state (h0 at lanes d_in:d_in+H, 1.0 at lane d_in+H) can be
    # planted with a single add.
    h_full = x_ref[...]                                   # (Bp, F) f32

    # 3 stacked single-step LSTM cells (seq_len == 1 in the PyTorch module).
    for layer in range(3):                                # static unroll
        xin = h_full + states_ref[2 * layer]              # [x|h0|1] packed operand
        # One fused bf16 MXU matmul per cell (bias arrives via the 1.0 lane).
        gates = jnp.dot(xin.astype(jnp.bfloat16), lstm_w_ref[layer],
                        preferred_element_type=jnp.float32)        # (Bp, G) f32
        # Two whole-tile EUP passes; gate picks are cheap lane slices.
        sig = jax.nn.sigmoid(gates)
        tg = jnp.tanh(gates)
        i = sig[:, 0 * H:1 * H]
        f = sig[:, 1 * H:2 * H]
        g = tg[:, 2 * H:3 * H]
        o = sig[:, 3 * H:4 * H]
        c0 = states_ref[2 * layer + 1][:, 0:H]
        c = f * c0 + i * g                                # f32 elementwise
        h = o * jnp.tanh(c)                               # (Bp, H) f32
        # dropout(p=0.6) in eval mode == identity
        # TODO(synk): training-mode dropout mask not implemented.
        if F > H:                                         # re-widen, lanes >= H zero
            h_full = jnp.concatenate(
                [h, jnp.zeros((Bp, F - H), jnp.float32)], axis=-1)
        else:
            h_full = h

    # MLP head: Linear+ReLU, Linear+ReLU, classifier Linear.  Weights bf16,
    # biases kept f32 (tiny, and avoids bf16-rounding the biases).
    r = h_full
    for j in range(2):
        r = jnp.maximum(
            jnp.dot(r.astype(jnp.bfloat16), head_w_ref[j],
                    preferred_element_type=jnp.float32) + head_b_ref[j], 0.0)
    out_ref[...] = (
        jnp.dot(r.astype(jnp.bfloat16), head_w_ref[2],
                preferred_element_type=jnp.float32) + head_b_ref[2])


# ----------------------------------------------------------------------------
# Wrapper
# ----------------------------------------------------------------------------
def dlcais_forward(x, packed, *, class_number):
    """x: (B, input_dim) float32. packed: dict from pack_params()."""
    lstm_w = packed["lstm_w"]
    states = packed["states"]
    head_w = packed["head_w"]
    head_b = packed["head_b"]
    F = packed["feat"]
    G = packed["gate"]
    H = packed["hidden"]
    Bp = packed["batch_pad"]

    B, D = x.shape
    # Single fused pad (4 KiB), no zeros+scatter materialization per call.
    x_pad = jnp.pad(x.astype(jnp.float32), ((0, Bp - B), (0, F - D)))

    # Advisory cost estimate (recomputed for the repacked operands).
    flops = 3 * 2 * Bp * F * G + 3 * 2 * Bp * F * F
    transc = 3 * (2 * Bp * G + Bp * H)
    bytes_accessed = int(
        x_pad.size * x_pad.dtype.itemsize
        + lstm_w.size * lstm_w.dtype.itemsize
        + states.size * states.dtype.itemsize
        + head_w.size * head_w.dtype.itemsize
        + head_b.size * head_b.dtype.itemsize
        + Bp * F * 4)

    vmem = pl.BlockSpec(memory_space=pltpu.MemorySpace.VMEM)
    out_pad = pl.pallas_call(
        functools.partial(_dlcais_kernel, hidden=H, feat=F),
        out_shape=jax.ShapeDtypeStruct((Bp, F), jnp.float32),
        in_specs=[vmem] * 5,
        out_specs=vmem,
        cost_estimate=pl.CostEstimate(flops=flops,
                                      transcendentals=transc,
                                      bytes_accessed=bytes_accessed),
    )(x_pad, lstm_w, states, head_w, head_b)
    # Padded batch rows carry the bias-1 lane (nonzero garbage); sliced off here.
    return out_pad[:B, :class_number]


# ----------------------------------------------------------------------------
# Synthetic parameters (shapes matching the PyTorch module) + packing
# ----------------------------------------------------------------------------
def make_params(key, input_dim, hidden_dim, class_number, batch):
    """Per LSTM layer: (wih.T (d_in,4H), whh.T (H,4H), b_ih+b_hh (1,4H),
    h0 (B,H), c0 (B,H)).  Head: wl1.T, bl1, wl2.T, bl2, wc.T, bc."""
    rep_dim = int(0.45 * input_dim)
    H = hidden_dim
    keys = iter(jax.random.split(key, 32))

    def uni(shape, scale):
        return jax.random.uniform(next(keys), shape, jnp.float32, -scale, scale)

    params = []
    scale = 1.0 / float(H) ** 0.5
    in_dims = [input_dim, H, H]
    for layer in range(3):
        d_in = in_dims[layer]
        wih_t = uni((d_in, 4 * H), scale)                       # weight_ih.T
        whh_t = uni((H, 4 * H), scale)                          # weight_hh.T
        b = uni((1, 4 * H), scale) + uni((1, 4 * H), scale)     # b_ih + b_hh
        h0 = jax.random.normal(next(keys), (batch, H), jnp.float32)
        c0 = jax.random.normal(next(keys), (batch, H), jnp.float32)
        params.extend([wih_t, whh_t, b, h0, c0])

    s1 = 1.0 / float(H) ** 0.5
    s2 = 1.0 / float(rep_dim) ** 0.5
    params.extend([
        uni((H, rep_dim), s1), uni((1, rep_dim), s1),
        uni((rep_dim, rep_dim), s2), uni((1, rep_dim), s2),
        uni((rep_dim, class_number), s2), uni((1, class_number), s2),
    ])
    return params, rep_dim


def pack_params(params, *, input_dim, hidden_dim, rep_dim, class_number, batch):
    """Pad / fuse everything into 5 lane-dense operands (weights in bf16)."""
    H, D = hidden_dim, input_dim
    # Lane width for fused LSTM inputs ([x|h0|1]) and the MLP head.
    F = _round_up(max(D + H + 1, 2 * H + 1, H, rep_dim, class_number), _LANE)
    G = _round_up(4 * H, _LANE)          # fused gate width (no per-gate padding)
    Bp = _round_up(batch, _SUBLANE)

    lstm_w, states = [], []
    in_dims = [D, H, H]
    for layer in range(3):
        wih_t, whh_t, b, h0, c0 = params[layer * 5: layer * 5 + 5]
        d_in = in_dims[layer]
        # Bias lane must stay in range (review correctness concern).
        assert d_in + H + 1 <= F, "bias lane would fall outside the packed width"
        W = jnp.zeros((F, G), jnp.float32)
        W = W.at[:d_in, :4 * H].set(wih_t)
        W = W.at[d_in:d_in + H, :4 * H].set(whh_t)
        W = W.at[d_in + H, :4 * H].set(b.reshape(-1))   # bias row hit by 1.0 lane
        lstm_w.append(W)

        h0p = jnp.zeros((Bp, F), jnp.float32).at[:batch, d_in:d_in + H].set(h0)
        # constant-1 bias lane (also on padded rows: harmless, sliced off later)
        h0p = h0p.at[:, d_in + H].set(1.0)
        c0p = jnp.zeros((Bp, F), jnp.float32).at[:batch, :H].set(c0)
        states.extend([h0p, c0p])

    lstm_w = jnp.stack(lstm_w).astype(jnp.bfloat16)     # (3, F, G) bf16
    states = jnp.stack(states)                          # (6, Bp, F) f32

    wl1, bl1, wl2, bl2, wc, bc = params[15:]

    def pad_mat(w):
        return jnp.zeros((F, F), jnp.float32).at[:w.shape[0], :w.shape[1]].set(w)

    def pad_vec(v):
        return jnp.zeros((1, F), jnp.float32).at[:, :v.shape[-1]].set(
            v.reshape(1, -1))

    head_w = jnp.stack([pad_mat(wl1), pad_mat(wl2),
                        pad_mat(wc)]).astype(jnp.bfloat16)        # (3, F, F) bf16
    head_b = jnp.stack([pad_vec(bl1), pad_vec(bl2), pad_vec(bc)])  # (3, 1, F) f32

    return dict(lstm_w=lstm_w, states=states, head_w=head_w, head_b=head_b,
                feat=F, gate=G, hidden=H, batch_pad=Bp)


# ----------------------------------------------------------------------------
# Pure-JAX reference (unpadded math) for correctness checking
# ----------------------------------------------------------------------------
def reference_forward(x, params, hidden_dim, *, mxu_dtype=jnp.float32):
    """mxu_dtype=jnp.bfloat16 mirrors the kernel's bf16 MXU operands exactly;
    mxu_dtype=jnp.float32 is the original full-f32 PyTorch math."""
    H = hidden_dim

    def mm(a, b):
        return jnp.dot(a.astype(mxu_dtype), b.astype(mxu_dtype),
                       preferred_element_type=jnp.float32)

    def q(v):  # value-level rounding matching the kernel's weight storage dtype
        return v.astype(mxu_dtype).astype(jnp.float32)

    def cell(xx, wih_t, whh_t, b, h0, c0):
        g = mm(xx, wih_t) + mm(h0, whh_t) + q(b)
        i = jax.nn.sigmoid(g[:, 0 * H:1 * H])
        f = jax.nn.sigmoid(g[:, 1 * H:2 * H])
        gg = jnp.tanh(g[:, 2 * H:3 * H])
        o = jax.nn.sigmoid(g[:, 3 * H:4 * H])
        c = f * c0 + i * gg
        return o * jnp.tanh(c)

    h = x
    for layer in range(3):
        h = cell(h, *params[layer * 5: layer * 5 + 5])
    wl1, bl1, wl2, bl2, wc, bc = params[15:]
    r = jnp.maximum(mm(h, wl1) + bl1, 0.0)
    r = jnp.maximum(mm(r, wl2) + bl2, 0.0)
    return mm(r, wc) + bc


if __name__ == "__main__":
    B = 4
    INPUT_DIM = 32
    HIDDEN_DIM = 32
    CLASS_NUMBER = 8

    key = jax.random.PRNGKey(0)
    k_x, k_p = jax.random.split(key)

    x = jax.random.normal(k_x, (B, INPUT_DIM), jnp.float32)
    params, rep_dim = make_params(k_p, INPUT_DIM, HIDDEN_DIM, CLASS_NUMBER, B)
    packed = pack_params(params, input_dim=INPUT_DIM, hidden_dim=HIDDEN_DIM,
                         rep_dim=rep_dim, class_number=CLASS_NUMBER, batch=B)

    out = dlcais_forward(x, packed, class_number=CLASS_NUMBER)
    out = jax.block_until_ready(out)
    assert out.shape == (B, CLASS_NUMBER)

    # Tight check vs. a reference mirroring the kernel's bf16 MXU operands.
    ref_bf16 = reference_forward(x, params, HIDDEN_DIM, mxu_dtype=jnp.bfloat16)
    err_b = jnp.max(jnp.abs(out - ref_bf16))
    assert jnp.allclose(out, ref_bf16, atol=3e-3, rtol=3e-3), (
        f"bf16-matched mismatch: max abs err {err_b}")

    # Loose fidelity check vs. the original full-f32 math (bf16 weights cost
    # ~1e-2 absolute on these logit magnitudes; tolerance loosened per review).
    ref_f32 = reference_forward(x, params, HIDDEN_DIM, mxu_dtype=jnp.float32)
    err_f = jnp.max(jnp.abs(out - ref_f32))
    assert jnp.allclose(out, ref_f32, atol=1e-1, rtol=1e-1), (
        f"f32 fidelity mismatch: max abs err {err_f}")

    print("KERNEL_OK")
</pallas_src>

<mosaic_0001>
module attributes {stable_mosaic.version = 11 : i64} {
  func.func @_dlcais_kernel(%arg0: memref<8x128xf32, #tpu.memory_space<vmem>>, %arg1: memref<3x128x128xbf16, #tpu.memory_space<vmem>>, %arg2: memref<6x8x128xf32, #tpu.memory_space<vmem>>, %arg3: memref<3x128x128xbf16, #tpu.memory_space<vmem>>, %arg4: memref<3x1x128xf32, #tpu.memory_space<vmem>>, %arg5: memref<8x128xf32, #tpu.memory_space<vmem>>) attributes {dimension_semantics = [], scalar_prefetch = 0 : i64, scratch_operands = 0 : i64, tpu.core_type = #tpu.core_type<tc>} {
    %c0 = arith.constant 0 : index
    %c0_0 = arith.constant 0 : index
    %0 = vector.load %arg0[%c0, %c0_0] : memref<8x128xf32, #tpu.memory_space<vmem>>, vector<8x128xf32>
    %c0_1 = arith.constant 0 : index
    %c0_2 = arith.constant 0 : index
    %c0_3 = arith.constant 0 : index
    %1 = vector.load %arg2[%c0_1, %c0_2, %c0_3] : memref<6x8x128xf32, #tpu.memory_space<vmem>>, vector<1x8x128xf32>
    %2 = vector.shape_cast %1 : vector<1x8x128xf32> to vector<8x128xf32>
    %3 = arith.addf %0, %2 : vector<8x128xf32>
    %4 = arith.truncf %3 : vector<8x128xf32> to vector<8x128xbf16>
    %c0_4 = arith.constant 0 : index
    %c0_5 = arith.constant 0 : index
    %c0_6 = arith.constant 0 : index
    %5 = vector.load %arg1[%c0_4, %c0_5, %c0_6] : memref<3x128x128xbf16, #tpu.memory_space<vmem>>, vector<1x128x128xbf16>
    %6 = vector.shape_cast %5 : vector<1x128x128xbf16> to vector<128x128xbf16>
    %cst = arith.constant dense<0.000000e+00> : vector<8x128xf32>
    %7 = tpu.matmul %4, %6, %cst {dimension_numbers = #tpu.dot_dimension_numbers<[1], [0], [0], [1], [0, 0, 1, 1], [], []>} : vector<8x128xbf16>, vector<128x128xbf16>, vector<8x128xf32> -> vector<8x128xf32>
    %8 = arith.negf %7 : vector<8x128xf32>
    %9 = math.exp %8 : vector<8x128xf32>
    %cst_7 = arith.constant 1.000000e+00 : f32
    %10 = vector.broadcast %cst_7 : f32 to vector<8x128xf32>
    %11 = arith.addf %10, %9 : vector<8x128xf32>
    %12 = arith.divf %10, %11 : vector<8x128xf32>
    %13 = math.tanh %7 : vector<8x128xf32>
    %14 = vector.extract_strided_slice %12 {offsets = [0, 0], sizes = [8, 32], strides = [1, 1]} : vector<8x128xf32> to vector<8x32xf32>
    %15 = vector.extract_strided_slice %12 {offsets = [0, 32], sizes = [8, 32], strides = [1, 1]} : vector<8x128xf32> to vector<8x32xf32>
    %16 = vector.extract_strided_slice %13 {offsets = [0, 64], sizes = [8, 32], strides = [1, 1]} : vector<8x128xf32> to vector<8x32xf32>
    %17 = vector.extract_strided_slice %12 {offsets = [0, 96], sizes = [8, 32], strides = [1, 1]} : vector<8x128xf32> to vector<8x32xf32>
    %c1 = arith.constant 1 : index
    %c0_8 = arith.constant 0 : index
    %c0_9 = arith.constant 0 : index
    %18 = vector.load %arg2[%c1, %c0_8, %c0_9] : memref<6x8x128xf32, #tpu.memory_space<vmem>>, vector<1x8x128xf32>
    %19 = vector.shape_cast %18 : vector<1x8x128xf32> to vector<8x128xf32>
    %20 = vector.extract_strided_slice %19 {offsets = [0, 0], sizes = [8, 32], strides = [1, 1]} : vector<8x128xf32> to vector<8x32xf32>
    %21 = arith.mulf %15, %20 : vector<8x32xf32>
    %22 = arith.mulf %14, %16 : vector<8x32xf32>
    %23 = arith.addf %21, %22 : vector<8x32xf32>
    %24 = math.tanh %23 : vector<8x32xf32>
    %25 = arith.mulf %17, %24 : vector<8x32xf32>
    %cst_10 = arith.constant 0.000000e+00 : f32
    %26 = vector.broadcast %cst_10 : f32 to vector<8x96xf32>
    %27 = tpu.concatenate %25, %26 in 1 : vector<8x32xf32>, vector<8x96xf32> -> vector<8x128xf32>
    %c2 = arith.constant 2 : index
    %c0_11 = arith.constant 0 : index
    %c0_12 = arith.constant 0 : index
    %28 = vector.load %arg2[%c2, %c0_11, %c0_12] : memref<6x8x128xf32, #tpu.memory_space<vmem>>, vector<1x8x128xf32>
    %29 = vector.shape_cast %28 : vector<1x8x128xf32> to vector<8x128xf32>
    %30 = arith.addf %27, %29 : vector<8x128xf32>
    %31 = arith.truncf %30 : vector<8x128xf32> to vector<8x128xbf16>
    %c1_13 = arith.constant 1 : index
    %c0_14 = arith.constant 0 : index
    %c0_15 = arith.constant 0 : index
    %32 = vector.load %arg1[%c1_13, %c0_14, %c0_15] : memref<3x128x128xbf16, #tpu.memory_space<vmem>>, vector<1x128x128xbf16>
    %33 = vector.shape_cast %32 : vector<1x128x128xbf16> to vector<128x128xbf16>
    %cst_16 = arith.constant dense<0.000000e+00> : vector<8x128xf32>
    %34 = tpu.matmul %31, %33, %cst_16 {dimension_numbers = #tpu.dot_dimension_numbers<[1], [0], [0], [1], [0, 0, 1, 1], [], []>} : vector<8x128xbf16>, vector<128x128xbf16>, vector<8x128xf32> -> vector<8x128xf32>
    %35 = arith.negf %34 : vector<8x128xf32>
    %36 = math.exp %35 : vector<8x128xf32>
    %cst_17 = arith.constant 1.000000e+00 : f32
    %37 = vector.broadcast %cst_17 : f32 to vector<8x128xf32>
    %38 = arith.addf %37, %36 : vector<8x128xf32>
    %39 = arith.divf %37, %38 : vector<8x128xf32>
    %40 = math.tanh %34 : vector<8x128xf32>
    %41 = vector.extract_strided_slice %39 {offsets = [0, 0], sizes = [8, 32], strides = [1, 1]} : vector<8x128xf32> to vector<8x32xf32>
    %42 = vector.extract_strided_slice %39 {offsets = [0, 32], sizes = [8, 32], strides = [1, 1]} : vector<8x128xf32> to vector<8x32xf32>
    %43 = vector.extract_strided_slice %40 {offsets = [0, 64], sizes = [8, 32], strides = [1, 1]} : vector<8x128xf32> to vector<8x32xf32>
    %44 = vector.extract_strided_slice %39 {offsets = [0, 96], sizes = [8, 32], strides = [1, 1]} : vector<8x128xf32> to vector<8x32xf32>
    %c3 = arith.constant 3 : index
    %c0_18 = arith.constant 0 : index
    %c0_19 = arith.constant 0 : index
    %45 = vector.load %arg2[%c3, %c0_18, %c0_19] : memref<6x8x128xf32, #tpu.memory_space<vmem>>, vector<1x8x128xf32>
    %46 = vector.shape_cast %45 : vector<1x8x128xf32> to vector<8x128xf32>
    %47 = vector.extract_strided_slice %46 {offsets = [0, 0], sizes = [8, 32], strides = [1, 1]} : vector<8x128xf32> to vector<8x32xf32>
    %48 = arith.mulf %42, %47 : vector<8x32xf32>
    %49 = arith.mulf %41, %43 : vector<8x32xf32>
    %50 = arith.addf %48, %49 : vector<8x32xf32>
    %51 = math.tanh %50 : vector<8x32xf32>
    %52 = arith.mulf %44, %51 : vector<8x32xf32>
    %cst_20 = arith.constant 0.000000e+00 : f32
    %53 = vector.broadcast %cst_20 : f32 to vector<8x96xf32>
    %54 = tpu.concatenate %52, %53 in 1 : vector<8x32xf32>, vector<8x96xf32> -> vector<8x128xf32>
    %c4 = arith.constant 4 : index
    %c0_21 = arith.constant 0 : index
    %c0_22 = arith.constant 0 : index
    %55 = vector.load %arg2[%c4, %c0_21, %c0_22] : memref<6x8x128xf32, #tpu.memory_space<vmem>>, vector<1x8x128xf32>
    %56 = vector.shape_cast %55 : vector<1x8x128xf32> to vector<8x128xf32>
    %57 = arith.addf %54, %56 : vector<8x128xf32>
    %58 = arith.truncf %57 : vector<8x128xf32> to vector<8x128xbf16>
    %c2_23 = arith.constant 2 : index
    %c0_24 = arith.constant 0 : index
    %c0_25 = arith.constant 0 : index
    %59 = vector.load %arg1[%c2_23, %c0_24, %c0_25] : memref<3x128x128xbf16, #tpu.memory_space<vmem>>, vector<1x128x128xbf16>
    %60 = vector.shape_cast %59 : vector<1x128x128xbf16> to vector<128x128xbf16>
    %cst_26 = arith.constant dense<0.000000e+00> : vector<8x128xf32>
    %61 = tpu.matmul %58, %60, %cst_26 {dimension_numbers = #tpu.dot_dimension_numbers<[1], [0], [0], [1], [0, 0, 1, 1], [], []>} : vector<8x128xbf16>, vector<128x128xbf16>, vector<8x128xf32> -> vector<8x128xf32>
    %62 = arith.negf %61 : vector<8x128xf32>
    %63 = math.exp %62 : vector<8x128xf32>
    %cst_27 = arith.constant 1.000000e+00 : f32
    %64 = vector.broadcast %cst_27 : f32 to vector<8x128xf32>
    %65 = arith.addf %64, %63 : vector<8x128xf32>
    %66 = arith.divf %64, %65 : vector<8x128xf32>
    %67 = math.tanh %61 : vector<8x128xf32>
    %68 = vector.extract_strided_slice %66 {offsets = [0, 0], sizes = [8, 32], strides = [1, 1]} : vector<8x128xf32> to vector<8x32xf32>
    %69 = vector.extract_strided_slice %66 {offsets = [0, 32], sizes = [8, 32], strides = [1, 1]} : vector<8x128xf32> to vector<8x32xf32>
    %70 = vector.extract_strided_slice %67 {offsets = [0, 64], sizes = [8, 32], strides = [1, 1]} : vector<8x128xf32> to vector<8x32xf32>
    %71 = vector.extract_strided_slice %66 {offsets = [0, 96], sizes = [8, 32], strides = [1, 1]} : vector<8x128xf32> to vector<8x32xf32>
    %c5 = arith.constant 5 : index
    %c0_28 = arith.constant 0 : index
    %c0_29 = arith.constant 0 : index
    %72 = vector.load %arg2[%c5, %c0_28, %c0_29] : memref<6x8x128xf32, #tpu.memory_space<vmem>>, vector<1x8x128xf32>
    %73 = vector.shape_cast %72 : vector<1x8x128xf32> to vector<8x128xf32>
    %74 = vector.extract_strided_slice %73 {offsets = [0, 0], sizes = [8, 32], strides = [1, 1]} : vector<8x128xf32> to vector<8x32xf32>
    %75 = arith.mulf %69, %74 : vector<8x32xf32>
    %76 = arith.mulf %68, %70 : vector<8x32xf32>
    %77 = arith.addf %75, %76 : vector<8x32xf32>
    %78 = math.tanh %77 : vector<8x32xf32>
    %79 = arith.mulf %71, %78 : vector<8x32xf32>
    %cst_30 = arith.constant 0.000000e+00 : f32
    %80 = vector.broadcast %cst_30 : f32 to vector<8x96xf32>
    %81 = tpu.concatenate %79, %80 in 1 : vector<8x32xf32>, vector<8x96xf32> -> vector<8x128xf32>
    %82 = arith.truncf %81 : vector<8x128xf32> to vector<8x128xbf16>
    %c0_31 = arith.constant 0 : index
    %c0_32 = arith.constant 0 : index
    %c0_33 = arith.constant 0 : index
    %83 = vector.load %arg3[%c0_31, %c0_32, %c0_33] : memref<3x128x128xbf16, #tpu.memory_space<vmem>>, vector<1x128x128xbf16>
    %84 = vector.shape_cast %83 : vector<1x128x128xbf16> to vector<128x128xbf16>
    %cst_34 = arith.constant dense<0.000000e+00> : vector<8x128xf32>
    %85 = tpu.matmul %82, %84, %cst_34 {dimension_numbers = #tpu.dot_dimension_numbers<[1], [0], [0], [1], [0, 0, 1, 1], [], []>} : vector<8x128xbf16>, vector<128x128xbf16>, vector<8x128xf32> -> vector<8x128xf32>
    %c0_35 = arith.constant 0 : index
    %c0_36 = arith.constant 0 : index
    %c0_37 = arith.constant 0 : index
    %86 = vector.load %arg4[%c0_35, %c0_36, %c0_37] : memref<3x1x128xf32, #tpu.memory_space<vmem>>, vector<1x1x128xf32>
    %87 = vector.shape_cast %86 : vector<1x1x128xf32> to vector<1x128xf32>
    %88 = vector.broadcast %87 : vector<1x128xf32> to vector<8x128xf32>
    %89 = arith.addf %85, %88 : vector<8x128xf32>
    %cst_38 = arith.constant 0.000000e+00 : f32
    %90 = vector.broadcast %cst_38 : f32 to vector<8x128xf32>
    %91 = arith.maximumf %89, %90 : vector<8x128xf32>
    %92 = arith.truncf %91 : vector<8x128xf32> to vector<8x128xbf16>
    %c1_39 = arith.constant 1 : index
    %c0_40 = arith.constant 0 : index
    %c0_41 = arith.constant 0 : index
    %93 = vector.load %arg3[%c1_39, %c0_40, %c0_41] : memref<3x128x128xbf16, #tpu.memory_space<vmem>>, vector<1x128x128xbf16>
    %94 = vector.shape_cast %93 : vector<1x128x128xbf16> to vector<128x128xbf16>
    %cst_42 = arith.constant dense<0.000000e+00> : vector<8x128xf32>
    %95 = tpu.matmul %92, %94, %cst_42 {dimension_numbers = #tpu.dot_dimension_numbers<[1], [0], [0], [1], [0, 0, 1, 1], [], []>} : vector<8x128xbf16>, vector<128x128xbf16>, vector<8x128xf32> -> vector<8x128xf32>
    %c1_43 = arith.constant 1 : index
    %c0_44 = arith.constant 0 : index
    %c0_45 = arith.constant 0 : index
    %96 = vector.load %arg4[%c1_43, %c0_44, %c0_45] : memref<3x1x128xf32, #tpu.memory_space<vmem>>, vector<1x1x128xf32>
    %97 = vector.shape_cast %96 : vector<1x1x128xf32> to vector<1x128xf32>
    %98 = vector.broadcast %97 : vector<1x128xf32> to vector<8x128xf32>
    %99 = arith.addf %95, %98 : vector<8x128xf32>
    %cst_46 = arith.constant 0.000000e+00 : f32
    %100 = vector.broadcast %cst_46 : f32 to vector<8x128xf32>
    %101 = arith.maximumf %99, %100 : vector<8x128xf32>
    %102 = arith.truncf %101 : vector<8x128xf32> to vector<8x128xbf16>
    %c2_47 = arith.constant 2 : index
    %c0_48 = arith.constant 0 : index
    %c0_49 = arith.constant 0 : index
    %103 = vector.load %arg3[%c2_47, %c0_48, %c0_49] : memref<3x128x128xbf16, #tpu.memory_space<vmem>>, vector<1x128x128xbf16>
    %104 = vector.shape_cast %103 : vector<1x128x128xbf16> to vector<128x128xbf16>
    %cst_50 = arith.constant dense<0.000000e+00> : vector<8x128xf32>
    %105 = tpu.matmul %102, %104, %cst_50 {dimension_numbers = #tpu.dot_dimension_numbers<[1], [0], [0], [1], [0, 0, 1, 1], [], []>} : vector<8x128xbf16>, vector<128x128xbf16>, vector<8x128xf32> -> vector<8x128xf32>
    %c2_51 = arith.constant 2 : index
    %c0_52 = arith.constant 0 : index
    %c0_53 = arith.constant 0 : index
    %106 = vector.load %arg4[%c2_51, %c0_52, %c0_53] : memref<3x1x128xf32, #tpu.memory_space<vmem>>, vector<1x1x128xf32>
    %107 = vector.shape_cast %106 : vector<1x1x128xf32> to vector<1x128xf32>
    %108 = vector.broadcast %107 : vector<1x128xf32> to vector<8x128xf32>
    %109 = arith.addf %105, %108 : vector<8x128xf32>
    %c0_54 = arith.constant 0 : index
    %c0_55 = arith.constant 0 : index
    %110 = vector.load %arg5[%c0_54, %c0_55] : memref<8x128xf32, #tpu.memory_space<vmem>>, vector<8x128xf32>
    tpu.vector_store %arg5[%c0_54, %c0_55], %109 {strides = array<i32>} : memref<8x128xf32, #tpu.memory_space<vmem>>, vector<8x128xf32>,
    return
  }
}

</mosaic_0001>

<bundles_post_ra>
// kernel: tpu_custom_call.1
= control target key start
LH: loop header
LB: loop body
LE: loop exit
PB: predicated region body
PF: predicated region fallthrough
CT: control target
= control target key end

     0   :  { %10 = vsyncpa [#allocation3], 0  ;;  %s1498_s0 = inlined_call_operand.hbm [shape: f32[8,128], index: 0, kind: input, shape index: {}]   ;;  %s1499_s1 = inlined_call_operand.hbm [shape: bf16[3,128,128], index: 1, kind: input, shape index: {}]   ;;  %s1500_s2 = inlined_call_operand.hbm [shape: f32[6,8,128], index: 2, kind: input, shape index: {}]   ;;  %s1501_s3 = inlined_call_operand.hbm [shape: bf16[3,128,128], index: 3, kind: input, shape index: {}]   ;;  %s1502_s4 = inlined_call_operand.vmem [shape: f32[3,1,128], index: 4, kind: input, shape index: {}]   ;;  %s1503_s5 = inlined_call_operand.hbm [shape: f32[8,128], index: 5, kind: output, shape index: {}]  }
   0x1   :  { %11 = vsyncpa [#allocation6], 0 }
   0x2   :  { %12 = vsyncpa [#allocation9], 0 }
   0x3   :  { %13 = vsyncpa [#allocation4], 0  ;;  %s1302_s18 = smov [#allocation5]   ;;  %s1184_s22 = scalar_lea.hbm %s1499_s1, 3072 }
   0x4   :  { %s29_s19 = sshll.u32 %s1302_s18, 4  ;;  %p1185_p0 = scmp.ne.s32.totalorder %s1499_s1, %s1184_s22  ;;  %s30_s19 = int_to_ptr.vmem [resolvable:$true] %s29_s19 }
   0x5   :  { %p1188_p1 = scmp.lt.u32.totalorder %s1184_s22, %s1499_s1 }
   0x7   :  { %p1190_p2 = pnand %p1188_p1, %p1185_p0 }
   0x9   :  { %1193 = shalt.err (!%p1190_p2)
}
   0xa   :  { %s1194_s27 = scalar_lea.vmem %s30_s19, 3072  ;;  %p1199_p4 = scmp.lt.s32.totalorder %s30_s19, %s30_s19 }
   0xb   :  { %p1195_p3 = scmp.ne.s32.totalorder %s30_s19, %s1194_s27  ;;  %p1200_p5 = scmp.lt.s32.totalorder %s1194_s27, %s1194_s27 }
   0xd   :  { %p1201_p6 = por %p1200_p5, %p1199_p4 }
   0xf   :  { %p1202_p7 = pnand %p1201_p6, %p1195_p3 }
  0x11   :  { %1205 = shalt.err (!%p1202_p7)
}
  0x12   :  { %s1303_s28 = smov 64   ;;  %s1304_s29 = smov 4  }
  0x13   :  { %35 = dma.hbm_to_vmem [thread:$0]  %s1499_s1, 3072, %s30_s19, [#allocation6], %s1303_s28, %s1303_s28, %s1304_s29  }
  0x14   :  { %s1305_s7 = smov [#allocation2]   ;;  %s1306_s9 = smov [#allocation7]  }
  0x15   :  { %s20_s8 = sshll.u32 %s1305_s7, 4  ;;  %s41_s10 = sshll.u32 %s1306_s9, 4  ;;  %s21_s8 = int_to_ptr.vmem [resolvable:$true] %s20_s8  ;;  %s42_s10 = int_to_ptr.vmem [resolvable:$true] %s41_s10 }
  0x16   :  { %s1206_s13 = scalar_lea.hbm %s1498_s0, 128 }
  0x17   :  { %p1207_p8 = scmp.ne.s32.totalorder %s1498_s0, %s1206_s13  ;;  %p1210_p9 = scmp.lt.u32.totalorder %s1206_s13, %s1498_s0 }
  0x19   :  { %p1212_p10 = pnand %p1210_p9, %p1207_p8 }
  0x1b   :  { %1215 = shalt.err (!%p1212_p10)
}
  0x1c   :  { %s1216_s1 = scalar_lea.vmem %s21_s8, 128  ;;  %p1221_p12 = scmp.lt.s32.totalorder %s21_s8, %s21_s8 }
  0x1d   :  { %p1217_p11 = scmp.ne.s32.totalorder %s21_s8, %s1216_s1  ;;  %p1222_p13 = scmp.lt.s32.totalorder %s1216_s1, %s1216_s1 }
  0x1f   :  { %p1223_p0 = por %p1222_p13, %p1221_p12 }
  0x21   :  { %p1224_p1 = pnand %p1223_p0, %p1217_p11 }
  0x23   :  { %1227 = shalt.err (!%p1224_p1)
}
  0x24   :  { %23 = dma.hbm_to_vmem [thread:$0]  %s1498_s0, 128, %s21_s8, [#allocation3]  }
  0x25   :  { %s1228_s22 = scalar_lea.hbm %s1500_s2, 768 }
  0x26   :  { %p1229_p2 = scmp.ne.s32.totalorder %s1500_s2, %s1228_s22  ;;  %p1232_p3 = scmp.lt.u32.totalorder %s1228_s22, %s1500_s2 }
  0x28   :  { %p1234_p4 = pnand %p1232_p3, %p1229_p2 }
  0x2a   :  { %1237 = shalt.err (!%p1234_p4)
}
  0x2b   :  { %s1238_s27 = scalar_lea.vmem %s42_s10, 768  ;;  %p1243_p6 = scmp.lt.s32.totalorder %s42_s10, %s42_s10 }
  0x2c   :  { %p1239_p5 = scmp.ne.s32.totalorder %s42_s10, %s1238_s27  ;;  %p1244_p7 = scmp.lt.s32.totalorder %s1238_s27, %s1238_s27 }
  0x2e   :  { %p1245_p8 = por %p1244_p7, %p1243_p6 }
  0x30   :  { %p1246_p9 = pnand %p1245_p8, %p1239_p5 }
  0x32   :  { %1249 = shalt.err (!%p1246_p9)
}
  0x33   :  { %s1307_s0 = smov 128   ;;  %s1308_s30 = smov 8  }
  0x34   :  { %47 = dma.hbm_to_vmem [thread:$0]  %s1500_s2, 768, %s42_s10, [#allocation6], %s1307_s0, %s1307_s0, %s1308_s30  }
  0x35   :  { %s1309_s8 = smov [#allocation8]   ;;  %s1250_s13 = scalar_lea.hbm %s1501_s3, 3072 }
  0x36   :  { %s53_s9 = sshll.u32 %s1309_s8, 4  ;;  %p1251_p10 = scmp.ne.s32.totalorder %s1501_s3, %s1250_s13  ;;  %s54_s9 = int_to_ptr.vmem [resolvable:$true] %s53_s9 }
  0x37   :  { %p1254_p11 = scmp.lt.u32.totalorder %s1250_s13, %s1501_s3 }
  0x39   :  { %p1256_p12 = pnand %p1254_p11, %p1251_p10 }
  0x3b   :  { %1259 = shalt.err (!%p1256_p12)
}
  0x3c   :  { %s1260_s1 = scalar_lea.vmem %s54_s9, 3072  ;;  %p1265_p0 = scmp.lt.s32.totalorder %s54_s9, %s54_s9 }
  0x3d   :  { %p1261_p13 = scmp.ne.s32.totalorder %s54_s9, %s1260_s1  ;;  %p1266_p1 = scmp.lt.s32.totalorder %s1260_s1, %s1260_s1 }
  0x3f   :  { %p1267_p2 = por %p1266_p1, %p1265_p0 }
  0x41   :  { %p1268_p3 = pnand %p1267_p2, %p1261_p13 }
  0x43   :  { %1271 = shalt.err (!%p1268_p3)
}
  0x44   :  { %59 = dma.hbm_to_vmem [thread:$0]  %s1501_s3, 3072, %s54_s9, [#allocation9], %s1303_s28, %s1303_s28, %s1304_s29  }
  0x45   :  { %1294 = dma.done.wait [#allocation3], 128  }
  0x46   :  { %1295 = vsyncadd [#allocation3], 4294967168 }
  0x47   :  { %1296 = dma.done.wait [#allocation6], 3840  }
  0x48   :  { %1297 = vsyncadd [#allocation6], 4294963456 }
  0x49   :  { %1298 = dma.done.wait [#allocation9], 3072  }
  0x4a   :  { %1299 = vsyncadd [#allocation9], 4294964224  ;;  %v1310_v0 = vmov 0.0   ;;  %vm1311_vm0 = vmmov 0   ;;  %v1112_v1 = vld [vmem:[#allocation5] sm:$0xff]   ;;  %v1113_v2 = vld [vmem:[#allocation5 + $0x8] sm:$0xff]  }
  0x4b   :  { %980 = vmatprep.subr.bf16.mxu0 %v1310_v0  ;;  %996 = vmatprep.mubr.msk.bf16.mxu0 %vm1311_vm0, %v1310_v0  ;;  %v1114_v3 = vld [vmem:[#allocation5 + $0x10] sm:$0xff]   ;;  %v1115_v4 = vld [vmem:[#allocation5 + $0x18] sm:$0xff]   ;;  %v1116_v5 = vld [vmem:[#allocation5 + $0x20] sm:$0xff]   ;;  %s1312_s3 = smov 32   ;;  %vm217_vm1 = vcmask 261120   ;;  %s1313_s22 = smov [#allocation10]  }
  0x4c   :  { %1000 = vmatprep.subr.bf16.mxu1 %v1310_v0  ;;  %1016 = vmatprep.mubr.msk.bf16.mxu1 %vm1311_vm0, %v1310_v0  ;;  %v1117_v6 = vld [vmem:[#allocation5 + $0x28] sm:$0xff]   ;;  %v1118_v7 = vld [vmem:[#allocation5 + $0x30] sm:$0xff]   ;;  %v75_v8 = vld [vmem:[#allocation2] sm:$0xff]  ;;  %s856_s23 = sshll.u32 %s1313_s22, 4  ;;  %s857_s23 = int_to_ptr.vmem [resolvable:$true] %s856_s23 }
  0x4d   :  { %981 = vmatpush3.bf16.msra.mxu0 %v1112_v1  ;;  %v76_v9 = vld [vmem:[#allocation7] sm:$0xff]  ;;  %v1119_v10 = vld [vmem:[#allocation5 + $0x38] sm:$0xff]   ;;  %v191_v18 = vld [vmem:[#allocation7 + $0x8] sm:$0xff]  ;;  %s1272_s24 = scalar_lea.vmem %s857_s23, 128  ;;  %p1277_p5 = scmp.lt.s32.totalorder %s857_s23, %s857_s23 }
  0x4e   :  { %982 = vmatprep.subr.bf16.mxu0 %v1310_v0  ;;  %v77_v11 = vadd.f32 %v76_v9, %v75_v8  ;;  %v1120_v29 = vld [vmem:[#allocation5 + $0x40] sm:$0xff]   ;;  %v1121_v30 = vld [vmem:[#allocation5 + $0x48] sm:$0xff]   ;;  %v1122_v31 = vld [vmem:[#allocation5 + $0x50] sm:$0xff]   ;;  %p1273_p4 = scmp.ne.s32.totalorder %s857_s23, %s1272_s24  ;;  %p1278_p6 = scmp.lt.s32.totalorder %s1272_s24, %s1272_s24 }
  0x4f   :  { %1001 = vmatpush3.bf16.msra.mxu1 %v1120_v29  ;;  %v1123_v33 = vld [vmem:[#allocation5 + $0x58] sm:$0xff]   ;;  %v1124_v34 = vld [vmem:[#allocation5 + $0x60] sm:$0xff]   ;;  %v1125_v35 = vld [vmem:[#allocation5 + $0x68] sm:$0xff]  }
  0x50   :  { %v78_v12 = vpack.c.bf16 %v77_v11, %v77_v11  ;;  %1002 = vmatprep.subr.bf16.mxu1 %v1310_v0  ;;  %v1126_v36 = vld [vmem:[#allocation5 + $0x70] sm:$0xff]   ;;  %v1127_v37 = vld [vmem:[#allocation5 + $0x78] sm:$0xff]   ;;  %v1128_v61 = vld [vmem:[#allocation5 + $0x80] sm:$0xff]   ;;  %p1279_p7 = por %p1278_p6, %p1277_p5 }
  0x51   :  { %983 = vmatpush3.bf16.msra.mxu0 %v1113_v2  ;;  %v336_v40 = vld [vmem:[#allocation7 + $0x18] sm:$0xff]  ;;  %v220_v41 = vld [vmem:[#allocation7 + $0x10] sm:$0xff]  ;;  %v1129_v62 = vld [vmem:[#allocation5 + $0x88] sm:$0xff]  }
  0x52   :  { %984 = vmatprep.subr.bf16.mxu0 %v1310_v0  ;;  %v1130_v63 = vld [vmem:[#allocation5 + $0x90] sm:$0xff]   ;;  %v1131_v2 = vld [vmem:[#allocation5 + $0x98] sm:$0xff]   ;;  %v480_v9 = vld [vmem:[#allocation7 + $0x28] sm:$0xff]  ;;  %p1280_p8 = pnand %p1279_p7, %p1273_p4 }
  0x53   :  { %1003 = vmatpush3.bf16.msra.mxu1 %v1121_v30  ;;  %v1136_v30 = vld [vmem:[#allocation8] sm:$0xff]   ;;  %vm903_vm2 = vmpackc.low %vm217_vm1, %vm217_vm1 }
  0x54   :  { %1004 = vmatprep.subr.bf16.mxu1 %v1310_v0 }
  0x55   :  { %985 = vmatpush3.bf16.msra.mxu0 %v1114_v3  ;;  %v1132_v3 = vld [vmem:[#allocation5 + $0xa0] sm:$0xff]  }
  0x56   :  { %986 = vmatprep.subr.bf16.mxu0 %v1310_v0 }
  0x57   :  { %1005 = vmatpush3.bf16.msra.mxu1 %v1122_v31  ;;  %v1137_v31 = vld [vmem:[#allocation8 + $0x8] sm:$0xff]  }
  0x58   :  { %1006 = vmatprep.subr.bf16.mxu1 %v1310_v0 }
  0x59   :  { %987 = vmatpush3.bf16.msra.mxu0 %v1115_v4  ;;  %v1133_v4 = vld [vmem:[#allocation5 + $0xa8] sm:$0xff]  }
  0x5a   :  { %988 = vmatprep.subr.bf16.mxu0 %v1310_v0 }
  0x5b   :  { %1007 = vmatpush3.bf16.msra.mxu1 %v1123_v33 }
  0x5c   :  { %1008 = vmatprep.subr.bf16.mxu1 %v1310_v0 }
  0x5d   :  { %989 = vmatpush3.bf16.msra.mxu0 %v1116_v5  ;;  %v1134_v5 = vld [vmem:[#allocation5 + $0xb0] sm:$0xff]  }
  0x5e   :  { %990 = vmatprep.subr.bf16.mxu0 %v1310_v0 }
  0x5f   :  { %1009 = vmatpush3.bf16.msra.mxu1 %v1124_v34  ;;  %v1139_v34 = vld [vmem:[#allocation8 + $0x18] sm:$0xff]  }
  0x60   :  { %1010 = vmatprep.subr.bf16.mxu1 %v1310_v0 }
  0x61   :  { %991 = vmatpush3.bf16.msra.mxu0 %v1117_v6  ;;  %v1135_v6 = vld [vmem:[#allocation5 + $0xb8] sm:$0xff]  }
  0x62   :  { %992 = vmatprep.subr.bf16.mxu0 %v1310_v0 }
  0x63   :  { %1011 = vmatpush3.bf16.msra.mxu1 %v1125_v35  ;;  %v1140_v35 = vld [vmem:[#allocation8 + $0x20] sm:$0xff]  }
  0x64   :  { %1012 = vmatprep.subr.bf16.mxu1 %v1310_v0 }
  0x65   :  { %993 = vmatpush3.bf16.msra.mxu0 %v1118_v7 }
  0x66   :  { %994 = vmatprep.subr.bf16.mxu0 %v1310_v0 }
  0x67   :  { %1013 = vmatpush3.bf16.msra.mxu1 %v1126_v36  ;;  %v1141_v36 = vld [vmem:[#allocation8 + $0x28] sm:$0xff]  }
  0x68   :  { %1014 = vmatprep.subr.bf16.mxu1 %v1310_v0 }
  0x69   :  { %995 = vmatpush3.bf16.msra.mxu0 %v1119_v10  ;;  %v364_v10 = vld [vmem:[#allocation7 + $0x20] sm:$0xff] }
  0x6a   :  { %1020 = vmatprep.subr.bf16.mxu0 %v1310_v0 }
  0x6b   :  { %1015 = vmatpush3.bf16.msra.mxu1 %v1127_v37  ;;  %v1142_v37 = vld [vmem:[#allocation8 + $0x30] sm:$0xff]  }
  0x6c   :  { %997 = vmatmul.mubr.bf16.vlgmr.msra.gmra.mrb[0].mxu0 %v78_v12  ;;  %1040 = vmatprep.subr.bf16.mxu1 %v1310_v0 }
  0x6d   :  { %1036 = vmatprep.mubr.msk.bf16.mxu0 %vm1311_vm0, %v1310_v0  ;;  %1021 = vmatpush3.bf16.msra.mxu0 %v1128_v61 }
  0x6e   :  { %1022 = vmatprep.subr.bf16.mxu0 %v1310_v0 }
  0x71   :  { %1023 = vmatpush3.bf16.msra.mxu0 %v1129_v62 }
  0x72   :  { %1024 = vmatprep.subr.bf16.mxu0 %v1310_v0 }
  0x75   :  { %1025 = vmatpush3.bf16.msra.mxu0 %v1130_v63 }
  0x76   :  { %1026 = vmatprep.subr.bf16.mxu0 %v1310_v0 }
  0x79   :  { %1027 = vmatpush3.bf16.msra.mxu0 %v1131_v2  ;;  %v1158_v2 = vld [vmem:[#allocation8 + $0xb0] sm:$0xff]  }
  0x7a   :  { %1028 = vmatprep.subr.bf16.mxu0 %v1310_v0 }
  0x7d   :  { %1029 = vmatpush3.bf16.msra.mxu0 %v1132_v3  ;;  %v1159_v3 = vld [vmem:[#allocation8 + $0xb8] sm:$0xff]  }
  0x7e   :  { %1030 = vmatprep.subr.bf16.mxu0 %v1310_v0 }
  0x81   :  { %1031 = vmatpush3.bf16.msra.mxu0 %v1133_v4  ;;  %v907_v4 = vld [vmem:[%s1502_s4 + $0x1] ss:$0 sm:$0xff] }
  0x82   :  { %1032 = vmatprep.subr.bf16.mxu0 %v1310_v0 }
  0x85   :  { %1033 = vmatpush3.bf16.msra.mxu0 %v1134_v5 }
  0x86   :  { %1034 = vmatprep.subr.bf16.mxu0 %v1310_v0 }
  0x89   :  { %1035 = vmatpush3.bf16.msra.mxu0 %v1135_v6 }
  0x8a   :  { %1060 = vmatprep.subr.bf16.mxu0 %v1310_v0 }
 0x13f   :  { %v177_v13 = vpop.f32.mrb[0].mxu0 }
 0x140   :  { %1160 = vtanh.f32 %v177_v13  ;;  %v998_v14 = vpop.f32.mrb[1].mxu0  ;;  %v875_v19 = vmul.f32 -1.442695, %v177_v13 }
 0x141   :  { %v180_v15 = vpop.f32.mrb[2].mxu0 }
 0x142   :  { %v999_v16 = vpop.f32.mrb[3].mxu0  ;;  %1162 = vpow2.f32 %v875_v19 }
 0x14a   :  { %v1161_v17 = vpop.eup %1160 }
 0x14b   :  { %198 = vrot.lane.b32.xlu0 %v1161_v17, %s1303_s28 }
 0x14c   :  { %v1163_v20 = vpop.eup %1162 }
 0x14d   :  { %v186_v21 = vadd.f32 1.0, %v1163_v20 }
 0x14f   :  { %193 = vrot.lane.b32.xlu0 %v191_v18, %s1312_s3  ;;  %1164 = vrcp.f32 %v186_v21 }
 0x159   :  { %v1165_v22 = vpop.eup %1164 }
 0x1bd   :  { %v199_v23 = vpop.permute.xlu0 %198 }
 0x1be   :  { %v201_v24 = vmul.f32 %v1165_v22, %v199_v23 }
 0x1c0   :  { %203 = vrot.lane.b32.xlu1 %v201_v24, %s1312_s3 }
 0x1c1   :  { %v194_v25 = vpop.permute.xlu0 %193 }
 0x1c2   :  { %v196_v26 = vmul.f32 %v1165_v22, %v194_v25 }
 0x232   :  { %v204_v27 = vpop.permute.xlu1 %203 }
 0x233   :  { %v206_v28 = vadd.f32 %v204_v27, %v196_v26 }
 0x235   :  { %1166 = vtanh.f32 %v206_v28 }
 0x23f   :  { %v1167_v32 = vpop.eup %1166 }
 0x240   :  { %209 = vrot.lane.b32.xlu1 %v1167_v32, %s1303_s28  ;;  %v1138_v32 = vld [vmem:[#allocation8 + $0x10] sm:$0xff]  }
 0x2b2   :  { %v210_v38 = vpop.permute.xlu1 %209 }
 0x2b3   :  { %v212_v39 = vmul.f32 %v1165_v22, %v210_v38  ;;  %v1143_v38 = vld [vmem:[#allocation8 + $0x38] sm:$0xff]  }
 0x2b5   :  { %214 = vrot.lane.b32.xlu0 %v212_v39, %s1312_s3  ;;  %v1144_v39 = vld [vmem:[#allocation8 + $0x40] sm:$0xff]  }
 0x2b9   :  { %338 = vrot.lane.b32.xlu0 %v336_v40, %s1312_s3  ;;  %v1145_v40 = vld [vmem:[#allocation8 + $0x48] sm:$0xff]  }
 0x327   :  { %v215_v42 = vpop.permute.xlu0 %214 }
 0x328   :  { %v218_v43 = vsel %vm217_vm1, %v215_v42, 0.0 }
 0x329   :  { %v221_v44 = vadd.f32 %v220_v41, %v218_v43  ;;  %v1146_v41 = vld [vmem:[#allocation8 + $0x50] sm:$0xff]  }
 0x32b   :  { %v222_v45 = vpack.c.bf16 %v221_v44, %v221_v44  ;;  %v339_v57 = vpop.permute.xlu0 %338  ;;  %v1147_v44 = vld [vmem:[#allocation8 + $0x58] sm:$0xff]  }
 0x32d   :  { %1017 = vmatmul.mubr.bf16.vlgmr.msra.gmra.mrb[0].mxu1 %v222_v45  ;;  %v1148_v45 = vld [vmem:[#allocation8 + $0x60] sm:$0xff]  }
 0x32e   :  { %1056 = vmatprep.mubr.msk.bf16.mxu1 %vm1311_vm0, %v1310_v0  ;;  %1041 = vmatpush3.bf16.msra.mxu1 %v1136_v30 }
 0x32f   :  { %1042 = vmatprep.subr.bf16.mxu1 %v1310_v0 }
 0x332   :  { %1043 = vmatpush3.bf16.msra.mxu1 %v1137_v31 }
 0x333   :  { %1044 = vmatprep.subr.bf16.mxu1 %v1310_v0 }
 0x336   :  { %1045 = vmatpush3.bf16.msra.mxu1 %v1138_v32 }
 0x337   :  { %1046 = vmatprep.subr.bf16.mxu1 %v1310_v0 }
 0x33a   :  { %1047 = vmatpush3.bf16.msra.mxu1 %v1139_v34 }
 0x33b   :  { %1048 = vmatprep.subr.bf16.mxu1 %v1310_v0 }
 0x33e   :  { %1049 = vmatpush3.bf16.msra.mxu1 %v1140_v35 }
 0x33f   :  { %1050 = vmatprep.subr.bf16.mxu1 %v1310_v0 }
 0x342   :  { %1051 = vmatpush3.bf16.msra.mxu1 %v1141_v36 }
 0x343   :  { %1052 = vmatprep.subr.bf16.mxu1 %v1310_v0 }
 0x346   :  { %1053 = vmatpush3.bf16.msra.mxu1 %v1142_v37 }
 0x347   :  { %1054 = vmatprep.subr.bf16.mxu1 %v1310_v0 }
 0x34a   :  { %1055 = vmatpush3.bf16.msra.mxu1 %v1143_v38 }
 0x34b   :  { %1080 = vmatprep.subr.bf16.mxu1 %v1310_v0 }
 0x400   :  { %v322_v46 = vpop.f32.mrb[0].mxu1 }
 0x401   :  { %1168 = vtanh.f32 %v322_v46  ;;  %v1018_v47 = vpop.f32.mrb[1].mxu1  ;;  %v884_v51 = vmul.f32 -1.442695, %v322_v46  ;;  %v1149_v46 = vld [vmem:[#allocation8 + $0x68] sm:$0xff]  }
 0x402   :  { %v325_v48 = vpop.f32.mrb[2].mxu1 }
 0x403   :  { %v1019_v49 = vpop.f32.mrb[3].mxu1  ;;  %1170 = vpow2.f32 %v884_v51  ;;  %v1152_v51 = vld [vmem:[#allocation8 + $0x80] sm:$0xff]  }
 0x404   :  { %v1150_v49 = vld [vmem:[#allocation8 + $0x70] sm:$0xff]  }
 0x40b   :  { %v1169_v50 = vpop.eup %1168 }
 0x40c   :  { %343 = vrot.lane.b32.xlu1 %v1169_v50, %s1303_s28  ;;  %v1151_v50 = vld [vmem:[#allocation8 + $0x78] sm:$0xff]  }
 0x40d   :  { %v1171_v52 = vpop.eup %1170 }
 0x40e   :  { %v331_v53 = vadd.f32 1.0, %v1171_v52  ;;  %v1153_v52 = vld [vmem:[#allocation8 + $0x88] sm:$0xff]  }
 0x410   :  { %1172 = vrcp.f32 %v331_v53  ;;  %v1154_v53 = vld [vmem:[#allocation8 + $0x90] sm:$0xff]  }
 0x41a   :  { %v1173_v54 = vpop.eup %1172 }
 0x41b   :  { %v341_v58 = vmul.f32 %v1173_v54, %v339_v57  ;;  %v894_v57 = vld [vmem:[%s1502_s4] ss:$0 sm:$0xff] }
 0x47e   :  { %v344_v55 = vpop.permute.xlu1 %343 }
 0x47f   :  { %v346_v56 = vmul.f32 %v1173_v54, %v344_v55  ;;  %v1156_v55 = vld [vmem:[#allocation8 + $0xa0] sm:$0xff]  }
 0x481   :  { %348 = vrot.lane.b32.xlu1 %v346_v56, %s1312_s3  ;;  %v1157_v56 = vld [vmem:[#allocation8 + $0xa8] sm:$0xff]  }
 0x4f3   :  { %v349_v59 = vpop.permute.xlu1 %348 }
 0x4f4   :  { %v351_v60 = vadd.f32 %v349_v59, %v341_v58 }
 0x4f6   :  { %1174 = vtanh.f32 %v351_v60 }
 0x500   :  { %v1175_v1 = vpop.eup %1174 }
 0x501   :  { %354 = vrot.lane.b32.xlu0 %v1175_v1, %s1303_s28 }
 0x573   :  { %v355_v7 = vpop.permute.xlu0 %354 }
 0x574   :  { %v357_v8 = vmul.f32 %v1173_v54, %v355_v7  ;;  %v1155_v54 = vld [vmem:[#allocation8 + $0x98] sm:$0xff]  }
 0x576   :  { %359 = vrot.lane.b32.xlu1 %v357_v8, %s1312_s3 }
 0x57a   :  { %482 = vrot.lane.b32.xlu1 %v480_v9, %s1312_s3 }
 0x5e8   :  { %v360_v11 = vpop.permute.xlu1 %359 }
 0x5e9   :  { %v362_v12 = vsel %vm217_vm1, %v360_v11, 0.0 }
 0x5ea   :  { %v365_v13 = vadd.f32 %v364_v10, %v362_v12  ;;  %v917_v12 = vld [vmem:[%s1502_s4 + $0x2] ss:$0 sm:$0xff] }
 0x5ec   :  { %v366_v14 = vpack.c.bf16 %v365_v13, %v365_v13  ;;  %v483_v26 = vpop.permute.xlu1 %482 }
 0x5ee   :  { %1037 = vmatmul.mubr.bf16.vlgmr.msra.gmra.mrb[4].mxu0 %v366_v14 }
 0x5ef   :  { %1076 = vmatprep.mubr.msk.bf16.mxu0 %vm1311_vm0, %v1310_v0  ;;  %1061 = vmatpush3.bf16.msra.mxu0 %v1144_v39 }
 0x5f0   :  { %1062 = vmatprep.subr.bf16.mxu0 %v1310_v0 }
 0x5f3   :  { %1063 = vmatpush3.bf16.msra.mxu0 %v1145_v40 }
 0x5f4   :  { %1064 = vmatprep.subr.bf16.mxu0 %v1310_v0 }
 0x5f7   :  { %1065 = vmatpush3.bf16.msra.mxu0 %v1146_v41 }
 0x5f8   :  { %1066 = vmatprep.subr.bf16.mxu0 %v1310_v0 }
 0x5fb   :  { %1067 = vmatpush3.bf16.msra.mxu0 %v1147_v44 }
 0x5fc   :  { %1068 = vmatprep.subr.bf16.mxu0 %v1310_v0 }
 0x5ff   :  { %1069 = vmatpush3.bf16.msra.mxu0 %v1148_v45 }
 0x600   :  { %1070 = vmatprep.subr.bf16.mxu0 %v1310_v0 }
 0x603   :  { %1071 = vmatpush3.bf16.msra.mxu0 %v1149_v46 }
 0x604   :  { %1072 = vmatprep.subr.bf16.mxu0 %v1310_v0 }
 0x607   :  { %1073 = vmatpush3.bf16.msra.mxu0 %v1150_v49 }
 0x608   :  { %1074 = vmatprep.subr.bf16.mxu0 %v1310_v0 }
 0x60b   :  { %1075 = vmatpush3.bf16.msra.mxu0 %v1151_v50 }
 0x6c1   :  { %v466_v15 = vpop.f32.mrb[4].mxu0 }
 0x6c2   :  { %1176 = vtanh.f32 %v466_v15  ;;  %v1038_v16 = vpop.f32.mrb[5].mxu0  ;;  %v893_v20 = vmul.f32 -1.442695, %v466_v15 }
 0x6c3   :  { %v469_v17 = vpop.f32.mrb[6].mxu0 }
 0x6c4   :  { %v1039_v18 = vpop.f32.mrb[7].mxu0  ;;  %1178 = vpow2.f32 %v893_v20 }
 0x6cc   :  { %v1177_v19 = vpop.eup %1176 }
 0x6cd   :  { %487 = vrot.lane.b32.xlu0 %v1177_v19, %s1303_s28 }
 0x6ce   :  { %v1179_v21 = vpop.eup %1178 }
 0x6cf   :  { %v475_v22 = vadd.f32 1.0, %v1179_v21 }
 0x6d1   :  { %1180 = vrcp.f32 %v475_v22 }
 0x6db   :  { %v1181_v23 = vpop.eup %1180 }
 0x6dc   :  { %v485_v27 = vmul.f32 %v1181_v23, %v483_v26 }
 0x73f   :  { %v488_v24 = vpop.permute.xlu0 %487 }
 0x740   :  { %v490_v25 = vmul.f32 %v1181_v23, %v488_v24 }
 0x742   :  { %492 = vrot.lane.b32.xlu0 %v490_v25, %s1312_s3 }
 0x7b4   :  { %v493_v28 = vpop.permute.xlu0 %492 }
 0x7b5   :  { %v495_v29 = vadd.f32 %v493_v28, %v485_v27 }
 0x7b7   :  { %1182 = vtanh.f32 %v495_v29 }
 0x7c1   :  { %v1183_v33 = vpop.eup %1182 }
 0x7c2   :  { %498 = vrot.lane.b32.xlu1 %v1183_v33, %s1303_s28 }
 0x834   :  { %v499_v42 = vpop.permute.xlu1 %498 }
 0x835   :  { %v501_v43 = vmul.f32 %v1181_v23, %v499_v42 }
 0x837   :  { %503 = vrot.lane.b32.xlu0 %v501_v43, %s1312_s3 }
 0x8a9   :  { %v504_v47 = vpop.permute.xlu0 %503 }
 0x8aa   :  { %v904_v48 = vpack.c.bf16 %v504_v47, %v504_v47 }
 0x8ac   :  { %1057 = vmatmul.mubr.msk.bf16.vlgmr.msra.gmra.mrb[4].mxu1 %vm903_vm2, %v904_v48 }
 0x8ad   :  { %1096 = vmatprep.mubr.msk.bf16.mxu1 %vm1311_vm0, %v1310_v0  ;;  %1081 = vmatpush3.bf16.msra.mxu1 %v1152_v51 }
 0x8ae   :  { %1082 = vmatprep.subr.bf16.mxu1 %v1310_v0 }
 0x8b1   :  { %1083 = vmatpush3.bf16.msra.mxu1 %v1153_v52 }
 0x8b2   :  { %1084 = vmatprep.subr.bf16.mxu1 %v1310_v0 }
 0x8b5   :  { %1085 = vmatpush3.bf16.msra.mxu1 %v1154_v53 }
 0x8b6   :  { %1086 = vmatprep.subr.bf16.mxu1 %v1310_v0 }
 0x8b9   :  { %1087 = vmatpush3.bf16.msra.mxu1 %v1155_v54 }
 0x8ba   :  { %1088 = vmatprep.subr.bf16.mxu1 %v1310_v0 }
 0x8bd   :  { %1089 = vmatpush3.bf16.msra.mxu1 %v1156_v55 }
 0x8be   :  { %1090 = vmatprep.subr.bf16.mxu1 %v1310_v0 }
 0x8c1   :  { %1091 = vmatpush3.bf16.msra.mxu1 %v1157_v56 }
 0x8c2   :  { %1092 = vmatprep.subr.bf16.mxu1 %v1310_v0 }
 0x8c5   :  { %1093 = vmatpush3.bf16.msra.mxu1 %v1158_v2 }
 0x8c6   :  { %1094 = vmatprep.subr.bf16.mxu1 %v1310_v0 }
 0x8c9   :  { %1095 = vmatpush3.bf16.msra.mxu1 %v1159_v3 }
 0x97f   :  { %v613_v58 = vpop.f32.mrb[4].mxu1 }
 0x980   :  { %v614_v59 = vadd.f32 %v894_v57, %v613_v58  ;;  %v1058_v60 = vpop.f32.mrb[5].mxu1 }
 0x981   :  { %v616_v61 = vpop.f32.mrb[6].mxu1 }
 0x982   :  { %v619_v62 = vmax.f32 %v614_v59, 0.0  ;;  %v1059_v63 = vpop.f32.mrb[7].mxu1 }
 0x984   :  { %v620_v1 = vpack.c.bf16 %v619_v62, %v619_v62 }
 0x986   :  { %1077 = vmatmul.mubr.bf16.vlgmr.msra.gmra.mrb[8].mxu0 %v620_v1 }
 0xa59   :  { %v728_v5 = vpop.f32.mrb[8].mxu0 }
 0xa5a   :  { %v729_v6 = vadd.f32 %v907_v4, %v728_v5  ;;  %v1078_v7 = vpop.f32.mrb[9].mxu0 }
 0xa5b   :  { %v731_v8 = vpop.f32.mrb[10].mxu0 }
 0xa5c   :  { %v734_v9 = vmax.f32 %v729_v6, 0.0  ;;  %v1079_v10 = vpop.f32.mrb[11].mxu0 }
 0xa5e   :  { %v735_v11 = vpack.c.bf16 %v734_v9, %v734_v9 }
 0xa60   :  { %1097 = vmatmul.mubr.bf16.vlgmr.msra.gmra.mrb[8].mxu1 %v735_v11 }
 0xb33   :  { %v843_v0 = vpop.f32.mrb[8].mxu1 }
 0xb34   :  { %v844_v13 = vadd.f32 %v917_v12, %v843_v0  ;;  %v1098_v14 = vpop.f32.mrb[9].mxu1 }
 0xb35   :  { %v846_v15 = vpop.f32.mrb[10].mxu1 }
 0xb36   :  { %849 = vst [vmem:[#allocation10] sm:$0xff] %v844_v13  ;;  %v1099_v16 = vpop.f32.mrb[11].mxu1 }
 0xb37   :  { %1283 = shalt.err (!%p1280_p8)
}
 0xb38   :  { %s1284_s4 = scalar_lea.hbm %s1503_s5, 128 }
 0xb39   :  { %p1285_p9 = scmp.ne.s32.totalorder %s1503_s5, %s1284_s4  ;;  %p1288_p10 = scmp.lt.u32.totalorder %s1284_s4, %s1503_s5 }
 0xb3b   :  { %p1290_p11 = pnand %p1288_p10, %p1285_p9 }
 0xb3d   :  { %1293 = shalt.err (!%p1290_p11)
}
 0xb3e   :  { %859 = dma.vmem_to_hbm [thread:$0]  %s857_s23, 128, %s1503_s5, [#allocation4]  }
 0xb3f   :  { %1300 = dma.done.wait [#allocation4], 128  }
 0xb40   :  { %1301 = vsyncadd [#allocation4], 4294967168 }
 0xb41   :  { %863 = vsyncpa [#allocation3], 1 }
 0xb42   :  { %864 = vsyncpa [#allocation6], 1 }
 0xb43   :  { %865 = vsyncpa [#allocation9], 1 }
 0xb44   :  { %866 = vsyncpa [#allocation4], 1 }

</bundles_post_ra>
